<compile_context>
chip_gen: v7x
topology: tpu7x:2x2x1
jax: 0.10.0
libtpu: 0.0.40
codegen_flags: <defaults>
</compile_context>

<pallas_src>
import jax
import jax.numpy as jnp
from jax.experimental import pallas as pl
from jax.experimental.pallas import tpu as pltpu


def _leaky_relu(x, negative_slope=0.01):
    return jnp.where(x > 0, x, negative_slope * x)


def _round_up(v, m):
    return ((v + m - 1) // m) * m


def _cdiv(a, b):
    return -(-a // b)


def _sublane(dtype):
    # Sublane granule: 8 rows for 4-byte, 16 for 2-byte, 32 for 1-byte dtypes.
    return {4: 8, 2: 16, 1: 32}.get(jnp.dtype(dtype).itemsize, 8)


def _mlp_kernel(x_ref, w1_ref, b1_ref, w2_ref, b2_ref, w3_ref, b3_ref, o_ref):
    # Three MXU matmuls (f32 accumulation) + bias + LeakyReLU, fully fused.
    # Intermediates live only in VMEM/vregs; only the x tile and y tile touch HBM.
    x = x_ref[...]  # native dtype straight into the MXU

    h = jnp.dot(x, w1_ref[...], preferred_element_type=jnp.float32) + b1_ref[...]
    h = _leaky_relu(h)

    h = jnp.dot(h.astype(w2_ref.dtype), w2_ref[...],
                preferred_element_type=jnp.float32) + b2_ref[...]
    h = _leaky_relu(h)

    y = jnp.dot(h.astype(w3_ref.dtype), w3_ref[...],
                preferred_element_type=jnp.float32) + b3_ref[...]
    o_ref[...] = y.astype(o_ref.dtype)


def mlp_forward(x, params, *, tm=1024, vmem_budget_bytes=48 * 1024 * 1024):
    """Fused 3-layer MLP forward.

    x: (N, in_nmap). params: (w1, b1, w2, b2, w3, b3) with w_i stored as
    (in, out) — i.e. the transpose of nn.Linear.weight — and b_i as (1, out).
    Returns (N, out_nmap) in x.dtype. No activation padding is performed; only
    the batch dimension is tiled.
    """
    w1, b1, w2, b2, w3, b3 = params
    N, in_dim = x.shape
    hid = w1.shape[1]
    out_dim = w3.shape[1]

    x_isz = jnp.dtype(x.dtype).itemsize
    w_isz = jnp.dtype(w1.dtype).itemsize
    sub = _sublane(x.dtype)

    weight_bytes = (in_dim * hid + hid * hid + hid * out_dim
                    + 2 * hid + out_dim) * w_isz

    def working_set(tile_m, weight_bufs):
        io = 2 * tile_m * (in_dim + out_dim) * x_isz        # double-buffered x/y tiles
        interm = 2 * tile_m * hid * 4                       # f32 h1/h2 intermediates
        return io + interm + weight_bufs * weight_bytes

    # --- batch tile selection -------------------------------------------------
    if N > tm:
        tile_m = tm
    elif N >= 256:
        # Split medium batches into (at least) two grid steps so the "parallel"
        # axis can shard across both TensorCores on v7x; harmless on 1-TC chips.
        tile_m = _round_up(_cdiv(N, 2), sub)
    else:
        tile_m = N  # full-extent row block: always layout-legal, single step

    # Clamp tile_m to the VMEM budget (worst case: double-buffered weights).
    while tile_m > 2 * sub and working_set(tile_m, 2) > vmem_budget_bytes:
        tile_m = _round_up(tile_m // 2, sub)

    grid = (_cdiv(N, tile_m),)

    # --- specs ---------------------------------------------------------------
    x_spec = pl.BlockSpec((tile_m, in_dim), lambda i: (i, 0))
    out_spec = pl.BlockSpec((tile_m, out_dim), lambda i: (i, 0))

    def weight_specs(pipeline_mode):
        kw = {} if pipeline_mode is None else {"pipeline_mode": pipeline_mode}
        const = lambda i: (0, 0)  # weights never change across grid steps
        return [
            pl.BlockSpec((in_dim, hid), const, **kw),    # w1
            pl.BlockSpec((1, hid), const, **kw),         # b1
            pl.BlockSpec((hid, hid), const, **kw),       # w2
            pl.BlockSpec((1, hid), const, **kw),         # b2
            pl.BlockSpec((hid, out_dim), const, **kw),   # w3
            pl.BlockSpec((1, out_dim), const, **kw),     # b3 (zeros)
        ]

    # Advisory cost: weights read once (resident across grid steps).
    flops = 2 * N * (in_dim * hid + hid * hid + hid * out_dim)
    bytes_accessed = N * (in_dim + out_dim) * x_isz + weight_bytes
    cost = pl.CostEstimate(flops=flops, transcendentals=0,
                           bytes_accessed=bytes_accessed)

    def run(weight_bufs, pipeline_mode):
        need = working_set(tile_m, weight_bufs)
        vmem_limit = int(min(64 * 1024 * 1024, max(2 * need, 16 * 1024 * 1024)))
        return pl.pallas_call(
            _mlp_kernel,
            out_shape=jax.ShapeDtypeStruct((N, out_dim), x.dtype),
            grid_spec=pltpu.PrefetchScalarGridSpec(
                num_scalar_prefetch=0,
                grid=grid,
                in_specs=[x_spec] + weight_specs(pipeline_mode),
                out_specs=out_spec,
            ),
            compiler_params=pltpu.CompilerParams(
                dimension_semantics=("parallel",),
                vmem_limit_bytes=vmem_limit,
            ),
            cost_estimate=cost,
        )(x, w1, b1, w2, b2, w3, b3)

    buffered = getattr(pl, "Buffered", None)
    if buffered is not None:
        try:
            # Single-buffer the constant weight/bias operands (halves their
            # VMEM residency). block_until_ready surfaces any lowering/runtime
            # rejection so we can fall back to default pipelining.
            out = run(1, buffered(1))
            jax.block_until_ready(out)
            return out
        except Exception:
            pass
    return run(2, None)


def init_mlp_params(key, in_nmap, hidden_nmap, out_nmap, layer_count=3,
                    dtype=jnp.float32):
    """Init mirroring the PyTorch module's parameter shapes.

    nn.Linear(in, out) stores weight as (out, in); we store the transpose
    (in, out) so the kernel does plain row-major matmuls. The final bias is
    zero-initialized, as in the module. Pass dtype=jnp.bfloat16 for MXU-native
    matmuls on large hidden sizes.
    """
    assert layer_count == 3, "kernel is specialized to layer_count=3 (2 hidden + output)"
    k1, k2, k3, k4, k5 = jax.random.split(key, 5)

    def kaiming_uniform(k, fan_in, shape):
        bound = 1.0 / jnp.sqrt(fan_in)
        return jax.random.uniform(k, shape, dtype, minval=-bound, maxval=bound)

    w1 = kaiming_uniform(k1, in_nmap, (in_nmap, hidden_nmap))
    b1 = kaiming_uniform(k2, in_nmap, (1, hidden_nmap))
    w2 = kaiming_uniform(k3, hidden_nmap, (hidden_nmap, hidden_nmap))
    b2 = kaiming_uniform(k4, hidden_nmap, (1, hidden_nmap))
    w3 = kaiming_uniform(k5, hidden_nmap, (hidden_nmap, out_nmap))
    b3 = jnp.zeros((1, out_nmap), dtype)  # nn.init.zeros_(last.bias)
    return (w1, b1, w2, b2, w3, b3)


def mlp_reference(x, params):
    w1, b1, w2, b2, w3, b3 = params
    h = _leaky_relu(x @ w1 + b1)
    h = _leaky_relu(h @ w2 + b2)
    return h @ w3 + b3


if __name__ == "__main__":
    key = jax.random.PRNGKey(0)
    kp, kx1, kx2, kx3 = jax.random.split(key, 4)

    in_nmap, hidden_nmap, out_nmap = 32, 64, 16
    params = init_mlp_params(kp, in_nmap, hidden_nmap, out_nmap, layer_count=3)

    # Small batch: single grid step, full-extent row block, no padding anywhere.
    x1 = jax.random.normal(kx1, (16, in_nmap), jnp.float32)
    y1 = jax.block_until_ready(mlp_forward(x1, params))
    assert y1.shape == (16, out_nmap)
    assert jnp.allclose(y1, mlp_reference(x1, params), atol=1e-5, rtol=1e-5), \
        "mismatch vs reference (small batch)"

    # Medium batch not a multiple of 8: 2-step grid (megacore-friendly) with a
    # partial trailing block (OOB rows dropped by Pallas; rows independent).
    x2 = jax.random.normal(kx2, (300, in_nmap), jnp.float32)
    y2 = jax.block_until_ready(mlp_forward(x2, params))
    assert y2.shape == (300, out_nmap)
    assert jnp.allclose(y2, mlp_reference(x2, params), atol=1e-5, rtol=1e-5), \
        "mismatch vs reference (medium batch)"

    # Larger batch: exercises the tm=1024 tiled path with a partial final block.
    x3 = jax.random.normal(kx3, (1500, in_nmap), jnp.float32)
    y3 = jax.block_until_ready(mlp_forward(x3, params, tm=1024))
    assert y3.shape == (1500, out_nmap)
    assert jnp.allclose(y3, mlp_reference(x3, params), atol=1e-5, rtol=1e-5), \
        "mismatch vs reference (large batch)"

    print("KERNEL_OK")
</pallas_src>

<mosaic_0001>
module attributes {stable_mosaic.version = 11 : i64} {
  func.func @_mlp_kernel(%arg0: i32, %arg1: memref<16x32xf32, #tpu.memory_space<vmem>>, %arg2: memref<32x64xf32, #tpu.memory_space<vmem>>, %arg3: memref<1x64xf32, #tpu.memory_space<vmem>>, %arg4: memref<64x64xf32, #tpu.memory_space<vmem>>, %arg5: memref<1x64xf32, #tpu.memory_space<vmem>>, %arg6: memref<64x16xf32, #tpu.memory_space<vmem>>, %arg7: memref<1x16xf32, #tpu.memory_space<vmem>>, %arg8: memref<16x16xf32, #tpu.memory_space<vmem>>) attributes {dimension_semantics = [#tpu.dimension_semantics<parallel>], iteration_bounds = array<i64: 1>, scalar_prefetch = 0 : i64, scratch_operands = 0 : i64, tpu.core_type = #tpu.core_type<tc>, window_params = [{transform_indices = @transform_0, window_bounds = array<i64: 16, 32>}, {pipeline_mode = #tpu.pipeline_mode<synchronous>, transform_indices = @transform_1, window_bounds = array<i64: 32, 64>}, {pipeline_mode = #tpu.pipeline_mode<synchronous>, transform_indices = @transform_2, window_bounds = array<i64: 1, 64>}, {pipeline_mode = #tpu.pipeline_mode<synchronous>, transform_indices = @transform_3, window_bounds = array<i64: 64, 64>}, {pipeline_mode = #tpu.pipeline_mode<synchronous>, transform_indices = @transform_4, window_bounds = array<i64: 1, 64>}, {pipeline_mode = #tpu.pipeline_mode<synchronous>, transform_indices = @transform_5, window_bounds = array<i64: 64, 16>}, {pipeline_mode = #tpu.pipeline_mode<synchronous>, transform_indices = @transform_6, window_bounds = array<i64: 1, 16>}, {transform_indices = @transform_7, window_bounds = array<i64: 16, 16>}]} {
    %c0 = arith.constant 0 : index
    %c0_0 = arith.constant 0 : index
    %0 = vector.load %arg1[%c0, %c0_0] : memref<16x32xf32, #tpu.memory_space<vmem>>, vector<16x32xf32>
    %c0_1 = arith.constant 0 : index
    %c0_2 = arith.constant 0 : index
    %1 = vector.load %arg2[%c0_1, %c0_2] : memref<32x64xf32, #tpu.memory_space<vmem>>, vector<32x64xf32>
    %cst = arith.constant dense<0.000000e+00> : vector<16x64xf32>
    %2 = tpu.matmul %0, %1, %cst {dimension_numbers = #tpu.dot_dimension_numbers<[1], [0], [0], [1], [0, 0, 1, 1], [], []>} : vector<16x32xf32>, vector<32x64xf32>, vector<16x64xf32> -> vector<16x64xf32>
    %c0_3 = arith.constant 0 : index
    %c0_4 = arith.constant 0 : index
    %3 = vector.load %arg3[%c0_3, %c0_4] : memref<1x64xf32, #tpu.memory_space<vmem>>, vector<1x64xf32>
    %4 = vector.broadcast %3 : vector<1x64xf32> to vector<16x64xf32>
    %5 = arith.addf %2, %4 : vector<16x64xf32>
    %cst_5 = arith.constant 0.000000e+00 : f32
    %6 = vector.broadcast %cst_5 : f32 to vector<16x64xf32>
    %7 = arith.cmpf ogt, %5, %6 : vector<16x64xf32>
    %cst_6 = arith.constant 0.00999999977 : f32
    %8 = vector.broadcast %cst_6 : f32 to vector<16x64xf32>
    %9 = arith.mulf %8, %5 : vector<16x64xf32>
    %10 = arith.select %7, %5, %9 : vector<16x64xi1>, vector<16x64xf32>
    %c0_7 = arith.constant 0 : index
    %c0_8 = arith.constant 0 : index
    %11 = vector.load %arg4[%c0_7, %c0_8] : memref<64x64xf32, #tpu.memory_space<vmem>>, vector<64x64xf32>
    %cst_9 = arith.constant dense<0.000000e+00> : vector<16x64xf32>
    %12 = tpu.matmul %10, %11, %cst_9 {dimension_numbers = #tpu.dot_dimension_numbers<[1], [0], [0], [1], [0, 0, 1, 1], [], []>} : vector<16x64xf32>, vector<64x64xf32>, vector<16x64xf32> -> vector<16x64xf32>
    %c0_10 = arith.constant 0 : index
    %c0_11 = arith.constant 0 : index
    %13 = vector.load %arg5[%c0_10, %c0_11] : memref<1x64xf32, #tpu.memory_space<vmem>>, vector<1x64xf32>
    %14 = vector.broadcast %13 : vector<1x64xf32> to vector<16x64xf32>
    %15 = arith.addf %12, %14 : vector<16x64xf32>
    %cst_12 = arith.constant 0.000000e+00 : f32
    %16 = vector.broadcast %cst_12 : f32 to vector<16x64xf32>
    %17 = arith.cmpf ogt, %15, %16 : vector<16x64xf32>
    %cst_13 = arith.constant 0.00999999977 : f32
    %18 = vector.broadcast %cst_13 : f32 to vector<16x64xf32>
    %19 = arith.mulf %18, %15 : vector<16x64xf32>
    %20 = arith.select %17, %15, %19 : vector<16x64xi1>, vector<16x64xf32>
    %c0_14 = arith.constant 0 : index
    %c0_15 = arith.constant 0 : index
    %21 = vector.load %arg6[%c0_14, %c0_15] : memref<64x16xf32, #tpu.memory_space<vmem>>, vector<64x16xf32>
    %cst_16 = arith.constant dense<0.000000e+00> : vector<16x16xf32>
    %22 = tpu.matmul %20, %21, %cst_16 {dimension_numbers = #tpu.dot_dimension_numbers<[1], [0], [0], [1], [0, 0, 1, 1], [], []>} : vector<16x64xf32>, vector<64x16xf32>, vector<16x16xf32> -> vector<16x16xf32>
    %c0_17 = arith.constant 0 : index
    %c0_18 = arith.constant 0 : index
    %23 = vector.load %arg7[%c0_17, %c0_18] : memref<1x16xf32, #tpu.memory_space<vmem>>, vector<1x16xf32>
    %24 = vector.broadcast %23 : vector<1x16xf32> to vector<16x16xf32>
    %25 = arith.addf %22, %24 : vector<16x16xf32>
    %c0_19 = arith.constant 0 : index
    %c0_20 = arith.constant 0 : index
    %26 = vector.load %arg8[%c0_19, %c0_20] : memref<16x16xf32, #tpu.memory_space<vmem>>, vector<16x16xf32>
    tpu.vector_store %arg8[%c0_19, %c0_20], %25 {strides = array<i32>} : memref<16x16xf32, #tpu.memory_space<vmem>>, vector<16x16xf32>,
    return
  }
  func.func @transform_0(%arg0: i32) -> (i32, i32) {
    %c0_i32 = arith.constant 0 : i32
    %c0_i32_0 = arith.constant 0 : i32
    return %arg0, %c0_i32 : i32, i32
  }
  func.func @transform_1(%arg0: i32) -> (i32, i32) {
    %c0_i32 = arith.constant 0 : i32
    %c0_i32_0 = arith.constant 0 : i32
    %c0_i32_1 = arith.constant 0 : i32
    return %c0_i32, %c0_i32_0 : i32, i32
  }
  func.func @transform_2(%arg0: i32) -> (i32, i32) {
    %c0_i32 = arith.constant 0 : i32
    %c0_i32_0 = arith.constant 0 : i32
    %c0_i32_1 = arith.constant 0 : i32
    return %c0_i32, %c0_i32_0 : i32, i32
  }
  func.func @transform_3(%arg0: i32) -> (i32, i32) {
    %c0_i32 = arith.constant 0 : i32
    %c0_i32_0 = arith.constant 0 : i32
    %c0_i32_1 = arith.constant 0 : i32
    return %c0_i32, %c0_i32_0 : i32, i32
  }
  func.func @transform_4(%arg0: i32) -> (i32, i32) {
    %c0_i32 = arith.constant 0 : i32
    %c0_i32_0 = arith.constant 0 : i32
    %c0_i32_1 = arith.constant 0 : i32
    return %c0_i32, %c0_i32_0 : i32, i32
  }
  func.func @transform_5(%arg0: i32) -> (i32, i32) {
    %c0_i32 = arith.constant 0 : i32
    %c0_i32_0 = arith.constant 0 : i32
    %c0_i32_1 = arith.constant 0 : i32
    return %c0_i32, %c0_i32_0 : i32, i32
  }
  func.func @transform_6(%arg0: i32) -> (i32, i32) {
    %c0_i32 = arith.constant 0 : i32
    %c0_i32_0 = arith.constant 0 : i32
    %c0_i32_1 = arith.constant 0 : i32
    return %c0_i32, %c0_i32_0 : i32, i32
  }
  func.func @transform_7(%arg0: i32) -> (i32, i32) {
    %c0_i32 = arith.constant 0 : i32
    %c0_i32_0 = arith.constant 0 : i32
    return %arg0, %c0_i32 : i32, i32
  }
}

module attributes {stable_mosaic.version = 11 : i64} {
  func.func @_mlp_kernel(%arg0: i32, %arg1: memref<16x32xf32, #tpu.memory_space<vmem>>, %arg2: memref<32x64xf32, #tpu.memory_space<vmem>>, %arg3: memref<1x64xf32, #tpu.memory_space<vmem>>, %arg4: memref<64x64xf32, #tpu.memory_space<vmem>>, %arg5: memref<1x64xf32, #tpu.memory_space<vmem>>, %arg6: memref<64x16xf32, #tpu.memory_space<vmem>>, %arg7: memref<1x16xf32, #tpu.memory_space<vmem>>, %arg8: memref<16x16xf32, #tpu.memory_space<vmem>>) attributes {dimension_semantics = [#tpu.dimension_semantics<parallel>], iteration_bounds = array<i64: 1>, scalar_prefetch = 0 : i64, scratch_operands = 0 : i64, tpu.core_type = #tpu.core_type<tc>, window_params = [{transform_indices = @transform_0, window_bounds = array<i64: 16, 32>}, {pipeline_mode = #tpu.pipeline_mode<synchronous>, transform_indices = @transform_1, window_bounds = array<i64: 32, 64>}, {pipeline_mode = #tpu.pipeline_mode<synchronous>, transform_indices = @transform_2, window_bounds = array<i64: 1, 64>}, {pipeline_mode = #tpu.pipeline_mode<synchronous>, transform_indices = @transform_3, window_bounds = array<i64: 64, 64>}, {pipeline_mode = #tpu.pipeline_mode<synchronous>, transform_indices = @transform_4, window_bounds = array<i64: 1, 64>}, {pipeline_mode = #tpu.pipeline_mode<synchronous>, transform_indices = @transform_5, window_bounds = array<i64: 64, 16>}, {pipeline_mode = #tpu.pipeline_mode<synchronous>, transform_indices = @transform_6, window_bounds = array<i64: 1, 16>}, {transform_indices = @transform_7, window_bounds = array<i64: 16, 16>}]} {
    %c0 = arith.constant 0 : index
    %c0_0 = arith.constant 0 : index
    %0 = vector.load %arg1[%c0, %c0_0] : memref<16x32xf32, #tpu.memory_space<vmem>>, vector<16x32xf32>
    %c0_1 = arith.constant 0 : index
    %c0_2 = arith.constant 0 : index
    %1 = vector.load %arg2[%c0_1, %c0_2] : memref<32x64xf32, #tpu.memory_space<vmem>>, vector<32x64xf32>
    %cst = arith.constant dense<0.000000e+00> : vector<16x64xf32>
    %2 = tpu.matmul %0, %1, %cst {dimension_numbers = #tpu.dot_dimension_numbers<[1], [0], [0], [1], [0, 0, 1, 1], [], []>} : vector<16x32xf32>, vector<32x64xf32>, vector<16x64xf32> -> vector<16x64xf32>
    %c0_3 = arith.constant 0 : index
    %c0_4 = arith.constant 0 : index
    %3 = vector.load %arg3[%c0_3, %c0_4] : memref<1x64xf32, #tpu.memory_space<vmem>>, vector<1x64xf32>
    %4 = vector.broadcast %3 : vector<1x64xf32> to vector<16x64xf32>
    %5 = arith.addf %2, %4 : vector<16x64xf32>
    %cst_5 = arith.constant 0.000000e+00 : f32
    %6 = vector.broadcast %cst_5 : f32 to vector<16x64xf32>
    %7 = arith.cmpf ogt, %5, %6 : vector<16x64xf32>
    %cst_6 = arith.constant 0.00999999977 : f32
    %8 = vector.broadcast %cst_6 : f32 to vector<16x64xf32>
    %9 = arith.mulf %8, %5 : vector<16x64xf32>
    %10 = arith.select %7, %5, %9 : vector<16x64xi1>, vector<16x64xf32>
    %c0_7 = arith.constant 0 : index
    %c0_8 = arith.constant 0 : index
    %11 = vector.load %arg4[%c0_7, %c0_8] : memref<64x64xf32, #tpu.memory_space<vmem>>, vector<64x64xf32>
    %cst_9 = arith.constant dense<0.000000e+00> : vector<16x64xf32>
    %12 = tpu.matmul %10, %11, %cst_9 {dimension_numbers = #tpu.dot_dimension_numbers<[1], [0], [0], [1], [0, 0, 1, 1], [], []>} : vector<16x64xf32>, vector<64x64xf32>, vector<16x64xf32> -> vector<16x64xf32>
    %c0_10 = arith.constant 0 : index
    %c0_11 = arith.constant 0 : index
    %13 = vector.load %arg5[%c0_10, %c0_11] : memref<1x64xf32, #tpu.memory_space<vmem>>, vector<1x64xf32>
    %14 = vector.broadcast %13 : vector<1x64xf32> to vector<16x64xf32>
    %15 = arith.addf %12, %14 : vector<16x64xf32>
    %cst_12 = arith.constant 0.000000e+00 : f32
    %16 = vector.broadcast %cst_12 : f32 to vector<16x64xf32>
    %17 = arith.cmpf ogt, %15, %16 : vector<16x64xf32>
    %cst_13 = arith.constant 0.00999999977 : f32
    %18 = vector.broadcast %cst_13 : f32 to vector<16x64xf32>
    %19 = arith.mulf %18, %15 : vector<16x64xf32>
    %20 = arith.select %17, %15, %19 : vector<16x64xi1>, vector<16x64xf32>
    %c0_14 = arith.constant 0 : index
    %c0_15 = arith.constant 0 : index
    %21 = vector.load %arg6[%c0_14, %c0_15] : memref<64x16xf32, #tpu.memory_space<vmem>>, vector<64x16xf32>
    %cst_16 = arith.constant dense<0.000000e+00> : vector<16x16xf32>
    %22 = tpu.matmul %20, %21, %cst_16 {dimension_numbers = #tpu.dot_dimension_numbers<[1], [0], [0], [1], [0, 0, 1, 1], [], []>} : vector<16x64xf32>, vector<64x16xf32>, vector<16x16xf32> -> vector<16x16xf32>
    %c0_17 = arith.constant 0 : index
    %c0_18 = arith.constant 0 : index
    %23 = vector.load %arg7[%c0_17, %c0_18] : memref<1x16xf32, #tpu.memory_space<vmem>>, vector<1x16xf32>
    %24 = vector.broadcast %23 : vector<1x16xf32> to vector<16x16xf32>
    %25 = arith.addf %22, %24 : vector<16x16xf32>
    %c0_19 = arith.constant 0 : index
    %c0_20 = arith.constant 0 : index
    %26 = vector.load %arg8[%c0_19, %c0_20] : memref<16x16xf32, #tpu.memory_space<vmem>>, vector<16x16xf32>
    tpu.vector_store %arg8[%c0_19, %c0_20], %25 {strides = array<i32>} : memref<16x16xf32, #tpu.memory_space<vmem>>, vector<16x16xf32>,
    return
  }
  func.func @transform_0(%arg0: i32) -> (i32, i32) {
    %c0_i32 = arith.constant 0 : i32
    %c0_i32_0 = arith.constant 0 : i32
    return %arg0, %c0_i32 : i32, i32
  }
  func.func @transform_1(%arg0: i32) -> (i32, i32) {
    %c0_i32 = arith.constant 0 : i32
    %c0_i32_0 = arith.constant 0 : i32
    %c0_i32_1 = arith.constant 0 : i32
    return %c0_i32, %c0_i32_0 : i32, i32
  }
  func.func @transform_2(%arg0: i32) -> (i32, i32) {
    %c0_i32 = arith.constant 0 : i32
    %c0_i32_0 = arith.constant 0 : i32
    %c0_i32_1 = arith.constant 0 : i32
    return %c0_i32, %c0_i32_0 : i32, i32
  }
  func.func @transform_3(%arg0: i32) -> (i32, i32) {
    %c0_i32 = arith.constant 0 : i32
    %c0_i32_0 = arith.constant 0 : i32
    %c0_i32_1 = arith.constant 0 : i32
    return %c0_i32, %c0_i32_0 : i32, i32
  }
  func.func @transform_4(%arg0: i32) -> (i32, i32) {
    %c0_i32 = arith.constant 0 : i32
    %c0_i32_0 = arith.constant 0 : i32
    %c0_i32_1 = arith.constant 0 : i32
    return %c0_i32, %c0_i32_0 : i32, i32
  }
  func.func @transform_5(%arg0: i32) -> (i32, i32) {
    %c0_i32 = arith.constant 0 : i32
    %c0_i32_0 = arith.constant 0 : i32
    %c0_i32_1 = arith.constant 0 : i32
    return %c0_i32, %c0_i32_0 : i32, i32
  }
  func.func @transform_6(%arg0: i32) -> (i32, i32) {
    %c0_i32 = arith.constant 0 : i32
    %c0_i32_0 = arith.constant 0 : i32
    %c0_i32_1 = arith.constant 0 : i32
    return %c0_i32, %c0_i32_0 : i32, i32
  }
  func.func @transform_7(%arg0: i32) -> (i32, i32) {
    %c0_i32 = arith.constant 0 : i32
    %c0_i32_0 = arith.constant 0 : i32
    return %arg0, %c0_i32 : i32, i32
  }
}

</mosaic_0001>

<bundles_post_ra>
// kernel: tpu_custom_call.1
= control target key start
LH: loop header
LB: loop body
LE: loop exit
PB: predicated region body
PF: predicated region fallthrough
CT: control target
= control target key end

     0   :  { %12 = vsyncpa [#allocation3], 0  ;;  %s680_s0 = inlined_call_operand.vmem [shape: f32[16,32], index: 0, kind: input, shape index: {}]   ;;  %s681_s1 = inlined_call_operand.hbm [shape: f32[32,64], index: 1, kind: input, shape index: {}]   ;;  %s682_s2 = inlined_call_operand.vmem [shape: f32[1,64], index: 2, kind: input, shape index: {}]   ;;  %s683_s3 = inlined_call_operand.vmem [shape: f32[64,64], index: 3, kind: input, shape index: {}]   ;;  %s684_s4 = inlined_call_operand.vmem [shape: f32[1,64], index: 4, kind: input, shape index: {}]   ;;  %s685_s5 = inlined_call_operand.vmem [shape: f32[64,16], index: 5, kind: input, shape index: {}]   ;;  %s686_s6 = inlined_call_operand.vmem [shape: f32[1,16], index: 6, kind: input, shape index: {}]   ;;  %s687_s7 = inlined_call_operand.hbm [shape: f32[16,16], index: 7, kind: output, shape index: {}]  }
   0x1   :  { %13 = vsyncpa [#allocation4], 0  ;;  %s537_s24 = smov [#allocation2]   ;;  %s489_s28 = scalar_lea.hbm %s681_s1, 512 }
   0x2   :  { %s21_s25 = sshll.u32 %s537_s24, 4  ;;  %p490_p0 = scmp.ne.s32.totalorder %s681_s1, %s489_s28  ;;  %s22_s25 = int_to_ptr.vmem [resolvable:$true] %s21_s25 }
   0x3   :  { %p493_p1 = scmp.lt.u32.totalorder %s489_s28, %s681_s1 }
   0x5   :  { %p495_p2 = pnand %p493_p1, %p490_p0 }
   0x7   :  { %498 = shalt.err (!%p495_p2)
}
   0x8   :  { %s499_s10 = scalar_lea.vmem %s22_s25, 512  ;;  %p504_p4 = scmp.lt.s32.totalorder %s22_s25, %s22_s25 }
   0x9   :  { %p500_p3 = scmp.ne.s32.totalorder %s22_s25, %s499_s10  ;;  %p505_p5 = scmp.lt.s32.totalorder %s499_s10, %s499_s10 }
   0xb   :  { %p506_p6 = por %p505_p5, %p504_p4 }
   0xd   :  { %p507_p7 = pnand %p506_p6, %p500_p3 }
   0xf   :  { %510 = shalt.err (!%p507_p7)
}
  0x10   :  { %s538_s11 = smov 128   ;;  %s539_s12 = smov 8  }
  0x11   :  { %27 = dma.hbm_to_vmem [thread:$0]  %s681_s1, 512, %s22_s25, [#allocation3], %s538_s11, %s538_s11, %s539_s12  }
  0x12   :  { %533 = dma.done.wait [#allocation3], 512  }
  0x13   :  { %534 = vsyncadd [#allocation3], 4294966784  ;;  %vm54_vm0 = vcmask 261120   ;;  %v43_v0 = vld [vmem:[#allocation2] sm:$0xff]  ;;  %v44_v1 = vld [vmem:[#allocation2 + $0x8] sm:$0xff]  ;;  %vm157_vm3 = vcmask 523264  }
  0x14   :  { %v45_v2 = vld [vmem:[#allocation2 + $0x10] sm:$0xff]  ;;  %v445_v3 = vpack.c.bf16 %v44_v1, %v43_v0  ;;  %v46_v4 = vld [vmem:[#allocation2 + $0x18] sm:$0xff]  ;;  %v41_v5 = vld [vmem:[%s680_s0] sm:$0xff]  ;;  %s540_s30 = smov [#allocation5]   ;;  %vm341_vm6 = vcmask 130048  }
  0x15   :  { %v449_v6 = vpack.c.bf16 %v46_v4, %v45_v2  ;;  %404 = vmatprep.mubr.msk.f32.mxu0 %vm54_vm0, %v41_v5  ;;  %v142_v7 = vld [vmem:[%s683_s3] sm:$0xff]  ;;  %v143_v8 = vld [vmem:[%s683_s3 + $0x8] sm:$0xff]  ;;  %v144_v9 = vld [vmem:[%s683_s3 + $0x10] sm:$0xff] }
  0x16   :  { %446 = vmatprep.subr.bf16.mxu0 %v445_v3  ;;  %v453_v10 = vpack.c.bf16 %v143_v8, %v142_v7  ;;  %v145_v11 = vld [vmem:[%s683_s3 + $0x18] sm:$0xff]  ;;  %v42_v13 = vld [vmem:[%s680_s0 + $0x8] sm:$0xff]  ;;  %v146_v14 = vld [vmem:[%s683_s3 + $0x20] sm:$0xff] }
  0x17   :  { %448 = vmatpush3.bf16.msra.mxu0 %v445_v3  ;;  %v457_v12 = vpack.c.bf16 %v145_v11, %v144_v9  ;;  %v147_v15 = vld [vmem:[%s683_s3 + $0x28] sm:$0xff]  ;;  %v148_v17 = vld [vmem:[%s683_s3 + $0x30] sm:$0xff]  ;;  %v149_v18 = vld [vmem:[%s683_s3 + $0x38] sm:$0xff] }
  0x18   :  { %450 = vmatprep.subr.bf16.mxu0 %v449_v6  ;;  %454 = vmatprep.subr.bf16.mxu1 %v453_v10  ;;  %v461_v16 = vpack.c.bf16 %v147_v15, %v146_v14  ;;  %v465_v19 = vpack.c.bf16 %v149_v18, %v148_v17  ;;  %v245_v20 = vld [vmem:[%s685_s5] sm:$0xff]  ;;  %v246_v21 = vld [vmem:[%s685_s5 + $0x8] sm:$0xff]  ;;  %v247_v22 = vld [vmem:[%s685_s5 + $0x10] sm:$0xff] }
  0x19   :  { %456 = vmatpush3.bf16.msra.mxu1 %v453_v10  ;;  %v469_v23 = vpack.c.bf16 %v246_v21, %v245_v20  ;;  %v248_v24 = vld [vmem:[%s685_s5 + $0x18] sm:$0xff]  ;;  %v361_v26 = vld [vmem:[%s682_s2] ss:$0 sm:$0xff]  ;;  %v250_v36 = vld [vmem:[%s685_s5 + $0x28] sm:$0xff] }
  0x1a   :  { %458 = vmatprep.subr.bf16.mxu1 %v457_v12  ;;  %v473_v25 = vpack.c.bf16 %v248_v24, %v247_v22  ;;  %v249_v35 = vld [vmem:[%s685_s5 + $0x20] sm:$0xff]  ;;  %v251_v38 = vld [vmem:[%s685_s5 + $0x30] sm:$0xff]  ;;  %v252_v39 = vld [vmem:[%s685_s5 + $0x38] sm:$0xff] }
  0x1b   :  { %452 = vmatpush3.bf16.msra.mxu0 %v449_v6  ;;  %v477_v37 = vpack.c.bf16 %v250_v36, %v249_v35  ;;  %v481_v40 = vpack.c.bf16 %v252_v39, %v251_v38  ;;  %v364_v41 = vld [vmem:[%s684_s4] ss:$0 sm:$0xff]  ;;  %s349_s4 = sshll.u32 %s540_s30, 4  ;;  %s350_s4 = int_to_ptr.vmem [resolvable:$true] %s349_s4 }
  0x1c   :  { %470 = vmatprep.subr.bf16.mxu0 %v469_v23  ;;  %v367_v50 = vld [vmem:[%s686_s6] ss:$0 sm:$0xff]  ;;  %s511_s8 = scalar_lea.vmem %s350_s4, 256  ;;  %p516_p9 = scmp.lt.s32.totalorder %s350_s4, %s350_s4 }
  0x1d   :  { %460 = vmatpush3.bf16.msra.mxu1 %v457_v12  ;;  %p512_p8 = scmp.ne.s32.totalorder %s350_s4, %s511_s8  ;;  %p517_p10 = scmp.lt.s32.totalorder %s511_s8, %s511_s8 }
  0x1e   :  { %405 = vmatmul.mubr.msk.f32.vlgmr.msra.gmra.mrb[0].mxu0 %vm54_vm0, %v42_v13  ;;  %462 = vmatprep.subr.bf16.mxu1 %v461_v16 }
  0x1f   :  { %472 = vmatpush3.bf16.msra.mxu0 %v469_v23  ;;  %p518_p11 = por %p517_p10, %p516_p9 }
  0x20   :  { %474 = vmatprep.subr.bf16.mxu0 %v473_v25 }
  0x21   :  { %464 = vmatpush3.bf16.msra.mxu1 %v461_v16  ;;  %p519_p12 = pnand %p518_p11, %p512_p8 }
  0x22   :  { %466 = vmatprep.subr.bf16.mxu1 %v465_v19 }
  0x23   :  { %476 = vmatpush3.bf16.msra.mxu0 %v473_v25 }
  0x24   :  { %478 = vmatprep.subr.bf16.mxu0 %v477_v37 }
  0x25   :  { %468 = vmatpush3.bf16.msra.mxu1 %v465_v19 }
  0x27   :  { %480 = vmatpush3.bf16.msra.mxu0 %v477_v37 }
  0x28   :  { %482 = vmatprep.subr.bf16.mxu0 %v481_v40 }
  0x2b   :  { %484 = vmatpush3.bf16.msra.mxu0 %v481_v40 }
  0xf1   :  { %v406_v27 = vpop.f32.mrb[0].mxu0 }
  0xf2   :  { %v133_v28 = vadd.f32 %v406_v27, %v361_v26  ;;  %v127_v29 = vpop.f32.mrb[1].mxu0 }
  0xf3   :  { %v128_v30 = vadd.f32 %v361_v26, %v127_v29 }
  0xf4   :  { %v139_v31 = vmul.f32 0.01, %v133_v28  ;;  %vm137_vm1 = vcmp.gt.f32.partialorder %v133_v28, 0.0 }
  0xf5   :  { %vm136_vm2 = vcmp.gt.f32.partialorder %v128_v30, 0.0  ;;  %v138_v32 = vmul.f32 0.01, %v128_v30 }
  0xf6   :  { %v141_v34 = vsel %vm137_vm1, %v133_v28, %v139_v31 }
  0xf7   :  { %v140_v33 = vsel %vm136_vm2, %v128_v30, %v138_v32 }
  0xf8   :  { %423 = vmatprep.mubr.msk.f32.mxu1 %vm157_vm3, %v140_v33 }
  0xf9   :  { %424 = vmatmul.mubr.msk.f32.vlgmr.msra.gmra.mrb[0].mxu1 %vm157_vm3, %v141_v34 }
 0x1cc   :  { %v425_v42 = vpop.f32.mrb[0].mxu1 }
 0x1cd   :  { %v236_v43 = vadd.f32 %v425_v42, %v364_v41  ;;  %v230_v44 = vpop.f32.mrb[1].mxu1 }
 0x1ce   :  { %v231_v45 = vadd.f32 %v364_v41, %v230_v44 }
 0x1cf   :  { %v242_v46 = vmul.f32 0.01, %v236_v43  ;;  %vm240_vm4 = vcmp.gt.f32.partialorder %v236_v43, 0.0 }
 0x1d0   :  { %vm239_vm5 = vcmp.gt.f32.partialorder %v231_v45, 0.0  ;;  %v241_v47 = vmul.f32 0.01, %v231_v45 }
 0x1d1   :  { %v244_v49 = vsel %vm240_vm4, %v236_v43, %v242_v46 }
 0x1d2   :  { %v243_v48 = vsel %vm239_vm5, %v231_v45, %v241_v47 }
 0x1d3   :  { %442 = vmatprep.mubr.msk.f32.mxu0 %vm157_vm3, %v243_v48 }
 0x1d4   :  { %443 = vmatmul.mubr.msk.f32.vlgmr.msra.gmra.mrb[2].mxu0 %vm157_vm3, %v244_v49 }
 0x2a7   :  { %v444_v51 = vpop.f32.mrb[2].mxu0 }
 0x2a8   :  { %v338_v52 = vadd.f32 %v444_v51, %v367_v50  ;;  %v332_v53 = vpop.f32.mrb[3].mxu0 }
 0x2a9   :  { %v333_v54 = vadd.f32 %v367_v50, %v332_v53 }
 0x2aa   :  { %343 = vst.msk [vmem:[#allocation5 + $0x8] sm:$0xff] %vm341_vm6, %v338_v52 }
 0x2ab   :  { %342 = vst.msk [vmem:[#allocation5] sm:$0xff] %vm341_vm6, %v333_v54 }
 0x2ac   :  { %522 = shalt.err (!%p519_p12)
}
 0x2ad   :  { %s523_s6 = scalar_lea.hbm %s687_s7, 256 }
 0x2ae   :  { %p524_p13 = scmp.ne.s32.totalorder %s687_s7, %s523_s6  ;;  %p527_p0 = scmp.lt.u32.totalorder %s523_s6, %s687_s7 }
 0x2b0   :  { %p529_p1 = pnand %p527_p0, %p524_p13 }
 0x2b2   :  { %532 = shalt.err (!%p529_p1)
}
 0x2b3   :  { %355 = dma.vmem_to_hbm [thread:$0]  %s350_s4, 256, %s687_s7, [#allocation4], %s538_s11, %s538_s11, %s539_s12  }
 0x2b4   :  { %535 = dma.done.wait [#allocation4], 256  }
 0x2b5   :  { %536 = vsyncadd [#allocation4], 4294967040 }
 0x2b6   :  { %359 = vsyncpa [#allocation3], 1 }
 0x2b7   :  { %360 = vsyncpa [#allocation4], 1 }

// kernel: tpu_custom_call.1
= control target key start
LH: loop header
LB: loop body
LE: loop exit
PB: predicated region body
PF: predicated region fallthrough
CT: control target
= control target key end

     0   :  { %12 = vsyncpa [#allocation3], 0  ;;  %s680_s0 = inlined_call_operand.vmem [shape: f32[16,32], index: 0, kind: input, shape index: {}]   ;;  %s681_s1 = inlined_call_operand.hbm [shape: f32[32,64], index: 1, kind: input, shape index: {}]   ;;  %s682_s2 = inlined_call_operand.vmem [shape: f32[1,64], index: 2, kind: input, shape index: {}]   ;;  %s683_s3 = inlined_call_operand.vmem [shape: f32[64,64], index: 3, kind: input, shape index: {}]   ;;  %s684_s4 = inlined_call_operand.vmem [shape: f32[1,64], index: 4, kind: input, shape index: {}]   ;;  %s685_s5 = inlined_call_operand.vmem [shape: f32[64,16], index: 5, kind: input, shape index: {}]   ;;  %s686_s6 = inlined_call_operand.vmem [shape: f32[1,16], index: 6, kind: input, shape index: {}]   ;;  %s687_s7 = inlined_call_operand.hbm [shape: f32[16,16], index: 7, kind: output, shape index: {}]  }
   0x1   :  { %13 = vsyncpa [#allocation4], 0  ;;  %s537_s24 = smov [#allocation2]   ;;  %s489_s28 = scalar_lea.hbm %s681_s1, 512 }
   0x2   :  { %s21_s25 = sshll.u32 %s537_s24, 4  ;;  %p490_p0 = scmp.ne.s32.totalorder %s681_s1, %s489_s28  ;;  %s22_s25 = int_to_ptr.vmem [resolvable:$true] %s21_s25 }
   0x3   :  { %p493_p1 = scmp.lt.u32.totalorder %s489_s28, %s681_s1 }
   0x5   :  { %p495_p2 = pnand %p493_p1, %p490_p0 }
   0x7   :  { %498 = shalt.err (!%p495_p2)
}
   0x8   :  { %s499_s10 = scalar_lea.vmem %s22_s25, 512  ;;  %p504_p4 = scmp.lt.s32.totalorder %s22_s25, %s22_s25 }
   0x9   :  { %p500_p3 = scmp.ne.s32.totalorder %s22_s25, %s499_s10  ;;  %p505_p5 = scmp.lt.s32.totalorder %s499_s10, %s499_s10 }
   0xb   :  { %p506_p6 = por %p505_p5, %p504_p4 }
   0xd   :  { %p507_p7 = pnand %p506_p6, %p500_p3 }
   0xf   :  { %510 = shalt.err (!%p507_p7)
}
  0x10   :  { %s538_s11 = smov 128   ;;  %s539_s12 = smov 8  }
  0x11   :  { %27 = dma.hbm_to_vmem [thread:$0]  %s681_s1, 512, %s22_s25, [#allocation3], %s538_s11, %s538_s11, %s539_s12  }
  0x12   :  { %533 = dma.done.wait [#allocation3], 512  }
  0x13   :  { %534 = vsyncadd [#allocation3], 4294966784  ;;  %vm54_vm0 = vcmask 261120   ;;  %v43_v0 = vld [vmem:[#allocation2] sm:$0xff]  ;;  %v44_v1 = vld [vmem:[#allocation2 + $0x8] sm:$0xff]  ;;  %vm157_vm3 = vcmask 523264  }
  0x14   :  { %v45_v2 = vld [vmem:[#allocation2 + $0x10] sm:$0xff]  ;;  %v445_v3 = vpack.c.bf16 %v44_v1, %v43_v0  ;;  %v46_v4 = vld [vmem:[#allocation2 + $0x18] sm:$0xff]  ;;  %v41_v5 = vld [vmem:[%s680_s0] sm:$0xff]  ;;  %s540_s30 = smov [#allocation5]   ;;  %vm341_vm6 = vcmask 130048  }
  0x15   :  { %v449_v6 = vpack.c.bf16 %v46_v4, %v45_v2  ;;  %404 = vmatprep.mubr.msk.f32.mxu0 %vm54_vm0, %v41_v5  ;;  %v142_v7 = vld [vmem:[%s683_s3] sm:$0xff]  ;;  %v143_v8 = vld [vmem:[%s683_s3 + $0x8] sm:$0xff]  ;;  %v144_v9 = vld [vmem:[%s683_s3 + $0x10] sm:$0xff] }
  0x16   :  { %446 = vmatprep.subr.bf16.mxu0 %v445_v3  ;;  %v453_v10 = vpack.c.bf16 %v143_v8, %v142_v7  ;;  %v145_v11 = vld [vmem:[%s683_s3 + $0x18] sm:$0xff]  ;;  %v42_v13 = vld [vmem:[%s680_s0 + $0x8] sm:$0xff]  ;;  %v146_v14 = vld [vmem:[%s683_s3 + $0x20] sm:$0xff] }
  0x17   :  { %448 = vmatpush3.bf16.msra.mxu0 %v445_v3  ;;  %v457_v12 = vpack.c.bf16 %v145_v11, %v144_v9  ;;  %v147_v15 = vld [vmem:[%s683_s3 + $0x28] sm:$0xff]  ;;  %v148_v17 = vld [vmem:[%s683_s3 + $0x30] sm:$0xff]  ;;  %v149_v18 = vld [vmem:[%s683_s3 + $0x38] sm:$0xff] }
  0x18   :  { %450 = vmatprep.subr.bf16.mxu0 %v449_v6  ;;  %454 = vmatprep.subr.bf16.mxu1 %v453_v10  ;;  %v461_v16 = vpack.c.bf16 %v147_v15, %v146_v14  ;;  %v465_v19 = vpack.c.bf16 %v149_v18, %v148_v17  ;;  %v245_v20 = vld [vmem:[%s685_s5] sm:$0xff]  ;;  %v246_v21 = vld [vmem:[%s685_s5 + $0x8] sm:$0xff]  ;;  %v247_v22 = vld [vmem:[%s685_s5 + $0x10] sm:$0xff] }
  0x19   :  { %456 = vmatpush3.bf16.msra.mxu1 %v453_v10  ;;  %v469_v23 = vpack.c.bf16 %v246_v21, %v245_v20  ;;  %v248_v24 = vld [vmem:[%s685_s5 + $0x18] sm:$0xff]  ;;  %v361_v26 = vld [vmem:[%s682_s2] ss:$0 sm:$0xff]  ;;  %v250_v36 = vld [vmem:[%s685_s5 + $0x28] sm:$0xff] }
  0x1a   :  { %458 = vmatprep.subr.bf16.mxu1 %v457_v12  ;;  %v473_v25 = vpack.c.bf16 %v248_v24, %v247_v22  ;;  %v249_v35 = vld [vmem:[%s685_s5 + $0x20] sm:$0xff]  ;;  %v251_v38 = vld [vmem:[%s685_s5 + $0x30] sm:$0xff]  ;;  %v252_v39 = vld [vmem:[%s685_s5 + $0x38] sm:$0xff] }
  0x1b   :  { %452 = vmatpush3.bf16.msra.mxu0 %v449_v6  ;;  %v477_v37 = vpack.c.bf16 %v250_v36, %v249_v35  ;;  %v481_v40 = vpack.c.bf16 %v252_v39, %v251_v38  ;;  %v364_v41 = vld [vmem:[%s684_s4] ss:$0 sm:$0xff]  ;;  %s349_s4 = sshll.u32 %s540_s30, 4  ;;  %s350_s4 = int_to_ptr.vmem [resolvable:$true] %s349_s4 }
  0x1c   :  { %470 = vmatprep.subr.bf16.mxu0 %v469_v23  ;;  %v367_v50 = vld [vmem:[%s686_s6] ss:$0 sm:$0xff]  ;;  %s511_s8 = scalar_lea.vmem %s350_s4, 256  ;;  %p516_p9 = scmp.lt.s32.totalorder %s350_s4, %s350_s4 }
  0x1d   :  { %460 = vmatpush3.bf16.msra.mxu1 %v457_v12  ;;  %p512_p8 = scmp.ne.s32.totalorder %s350_s4, %s511_s8  ;;  %p517_p10 = scmp.lt.s32.totalorder %s511_s8, %s511_s8 }
  0x1e   :  { %405 = vmatmul.mubr.msk.f32.vlgmr.msra.gmra.mrb[0].mxu0 %vm54_vm0, %v42_v13  ;;  %462 = vmatprep.subr.bf16.mxu1 %v461_v16 }
  0x1f   :  { %472 = vmatpush3.bf16.msra.mxu0 %v469_v23  ;;  %p518_p11 = por %p517_p10, %p516_p9 }
  0x20   :  { %474 = vmatprep.subr.bf16.mxu0 %v473_v25 }
  0x21   :  { %464 = vmatpush3.bf16.msra.mxu1 %v461_v16  ;;  %p519_p12 = pnand %p518_p11, %p512_p8 }
  0x22   :  { %466 = vmatprep.subr.bf16.mxu1 %v465_v19 }
  0x23   :  { %476 = vmatpush3.bf16.msra.mxu0 %v473_v25 }
  0x24   :  { %478 = vmatprep.subr.bf16.mxu0 %v477_v37 }
  0x25   :  { %468 = vmatpush3.bf16.msra.mxu1 %v465_v19 }
  0x27   :  { %480 = vmatpush3.bf16.msra.mxu0 %v477_v37 }
  0x28   :  { %482 = vmatprep.subr.bf16.mxu0 %v481_v40 }
  0x2b   :  { %484 = vmatpush3.bf16.msra.mxu0 %v481_v40 }
  0xf1   :  { %v406_v27 = vpop.f32.mrb[0].mxu0 }
  0xf2   :  { %v133_v28 = vadd.f32 %v406_v27, %v361_v26  ;;  %v127_v29 = vpop.f32.mrb[1].mxu0 }
  0xf3   :  { %v128_v30 = vadd.f32 %v361_v26, %v127_v29 }
  0xf4   :  { %v139_v31 = vmul.f32 0.01, %v133_v28  ;;  %vm137_vm1 = vcmp.gt.f32.partialorder %v133_v28, 0.0 }
  0xf5   :  { %vm136_vm2 = vcmp.gt.f32.partialorder %v128_v30, 0.0  ;;  %v138_v32 = vmul.f32 0.01, %v128_v30 }
  0xf6   :  { %v141_v34 = vsel %vm137_vm1, %v133_v28, %v139_v31 }
  0xf7   :  { %v140_v33 = vsel %vm136_vm2, %v128_v30, %v138_v32 }
  0xf8   :  { %423 = vmatprep.mubr.msk.f32.mxu1 %vm157_vm3, %v140_v33 }
  0xf9   :  { %424 = vmatmul.mubr.msk.f32.vlgmr.msra.gmra.mrb[0].mxu1 %vm157_vm3, %v141_v34 }
 0x1cc   :  { %v425_v42 = vpop.f32.mrb[0].mxu1 }
 0x1cd   :  { %v236_v43 = vadd.f32 %v425_v42, %v364_v41  ;;  %v230_v44 = vpop.f32.mrb[1].mxu1 }
 0x1ce   :  { %v231_v45 = vadd.f32 %v364_v41, %v230_v44 }
 0x1cf   :  { %v242_v46 = vmul.f32 0.01, %v236_v43  ;;  %vm240_vm4 = vcmp.gt.f32.partialorder %v236_v43, 0.0 }
 0x1d0   :  { %vm239_vm5 = vcmp.gt.f32.partialorder %v231_v45, 0.0  ;;  %v241_v47 = vmul.f32 0.01, %v231_v45 }
 0x1d1   :  { %v244_v49 = vsel %vm240_vm4, %v236_v43, %v242_v46 }
 0x1d2   :  { %v243_v48 = vsel %vm239_vm5, %v231_v45, %v241_v47 }
 0x1d3   :  { %442 = vmatprep.mubr.msk.f32.mxu0 %vm157_vm3, %v243_v48 }
 0x1d4   :  { %443 = vmatmul.mubr.msk.f32.vlgmr.msra.gmra.mrb[2].mxu0 %vm157_vm3, %v244_v49 }
 0x2a7   :  { %v444_v51 = vpop.f32.mrb[2].mxu0 }
 0x2a8   :  { %v338_v52 = vadd.f32 %v444_v51, %v367_v50  ;;  %v332_v53 = vpop.f32.mrb[3].mxu0 }
 0x2a9   :  { %v333_v54 = vadd.f32 %v367_v50, %v332_v53 }
 0x2aa   :  { %343 = vst.msk [vmem:[#allocation5 + $0x8] sm:$0xff] %vm341_vm6, %v338_v52 }
 0x2ab   :  { %342 = vst.msk [vmem:[#allocation5] sm:$0xff] %vm341_vm6, %v333_v54 }
 0x2ac   :  { %522 = shalt.err (!%p519_p12)
}
 0x2ad   :  { %s523_s6 = scalar_lea.hbm %s687_s7, 256 }
 0x2ae   :  { %p524_p13 = scmp.ne.s32.totalorder %s687_s7, %s523_s6  ;;  %p527_p0 = scmp.lt.u32.totalorder %s523_s6, %s687_s7 }
 0x2b0   :  { %p529_p1 = pnand %p527_p0, %p524_p13 }
 0x2b2   :  { %532 = shalt.err (!%p529_p1)
}
 0x2b3   :  { %355 = dma.vmem_to_hbm [thread:$0]  %s350_s4, 256, %s687_s7, [#allocation4], %s538_s11, %s538_s11, %s539_s12  }
 0x2b4   :  { %535 = dma.done.wait [#allocation4], 256  }
 0x2b5   :  { %536 = vsyncadd [#allocation4], 4294967040 }
 0x2b6   :  { %359 = vsyncpa [#allocation3], 1 }
 0x2b7   :  { %360 = vsyncpa [#allocation4], 1 }

</bundles_post_ra>
